<compile_context>
chip_gen: v7x
topology: tpu7x:2x2x1
jax: 0.10.0
libtpu: 0.0.40
codegen_flags: <defaults>
</compile_context>

<pallas_src>
import jax
import jax.numpy as jnp
from jax.experimental import pallas as pl
from jax.experimental.pallas import tpu as pltpu


def _round_up(x, m):
    return ((x + m - 1) // m) * m


def _pick_tile(total, candidates=(1024, 512, 256, 128)):
    """Largest tile <= candidates[0] that divides `total` (total % 128 == 0)."""
    if total <= candidates[0]:
        return total
    for c in candidates:
        if total % c == 0:
            return c
    return 128


# ----------------------------------------------------------------------------
# Kernel 1: per-graph GCN, selected rows only, X@W fused.
#   acc   += A_sel[g, :, k-tile] @ X[g, k-tile, :]          (accumulate over k)
#   H_sel  = relu(acc @ W + b)                               (at last k)
# A_sel holds the 2 normalized adjacency rows per graph, padded to 8 sublanes.
# ----------------------------------------------------------------------------
def _gcn_sel_rows_kernel(a_ref, x_ref, w_ref, b_ref, o_ref, acc_ref):
    k = pl.program_id(1)

    @pl.when(k == 0)
    def _():
        acc_ref[...] = jnp.zeros_like(acc_ref)

    # [8, tile_k] (bf16) @ [tile_k, dim_pad] (bf16) -> f32 accumulate
    acc_ref[...] += jnp.dot(a_ref[0], x_ref[0],
                            preferred_element_type=jnp.float32)

    @pl.when(k == pl.num_programs(1) - 1)
    def _():
        ax = acc_ref[...].astype(jnp.bfloat16)              # [8, dim_pad]
        h = jnp.dot(ax, w_ref[...], preferred_element_type=jnp.float32)
        o_ref[0] = jnp.maximum(h + b_ref[...], 0.0)


def gcn_selected_rows(a_sel, x_blk, w, b, *, tile_k):
    nb, _, npg_pad = a_sel.shape
    dim_pad = x_blk.shape[-1]
    gs_pad = w.shape[-1]
    nk = npg_pad // tile_k
    flops = 2 * nb * 8 * npg_pad * dim_pad + 2 * nb * 8 * dim_pad * gs_pad
    bytes_accessed = (a_sel.size * 2 + x_blk.size * 2 + w.size * 2
                      + nb * 8 * gs_pad * 4)
    return pl.pallas_call(
        _gcn_sel_rows_kernel,
        out_shape=jax.ShapeDtypeStruct((nb, 8, gs_pad), jnp.float32),
        grid=(nb, nk),
        in_specs=[
            pl.BlockSpec((1, 8, tile_k), lambda g, k: (g, 0, k)),       # A_sel
            pl.BlockSpec((1, tile_k, dim_pad), lambda g, k: (g, k, 0)),  # X
            pl.BlockSpec((dim_pad, gs_pad), lambda g, k: (0, 0)),        # W (resident)
            pl.BlockSpec((1, gs_pad), lambda g, k: (0, 0)),              # bias
        ],
        out_specs=pl.BlockSpec((1, 8, gs_pad), lambda g, k: (g, 0, 0)),
        scratch_shapes=[pltpu.VMEM((8, dim_pad), jnp.float32)],
        compiler_params=pltpu.CompilerParams(
            dimension_semantics=("parallel", "arbitrary"),
            vmem_limit_bytes=32 * 1024 * 1024),
        cost_estimate=pl.CostEstimate(flops=flops, transcendentals=0,
                                      bytes_accessed=bytes_accessed),
    )(a_sel, x_blk, w, b)


# ----------------------------------------------------------------------------
# Kernel 2: fusion (ir-score linear+relu, outer product) + K-tiled decoder MLP
#   S       = relu(ir @ W_ir + b_ir)            (cached in VMEM scratch at k==0)
#   outer_k = (x_pairs @ R_k) * (S @ T_k)       [TB, tile_kd]   (lane-dense)
#   acc    += outer_k @ W1_k                    (f32 accumulator over 4G^2)
#   logits  = relu(acc + b1) @ W2 + b2          (at last k)
# R[i, i*2G+j] = 1, T[j, i*2G+j] = 1 are constant selection matrices, so
# outer[b, i*2G+j] = x[b, i] * S[b, j] matches torch.bmm(x.unsq(2), S.unsq(1)).
# ----------------------------------------------------------------------------
def _fusion_decode_kernel(xp_ref, ir_ref, wir_ref, bir_ref, rep_ref, til_ref,
                          w1_ref, b1_ref, w2_ref, b2_ref, o_ref,
                          s_scr, acc_ref):
    k = pl.program_id(1)

    @pl.when(k == 0)
    def _():
        s = jnp.dot(ir_ref[...], wir_ref[...], preferred_element_type=jnp.float32)
        s_scr[...] = jnp.maximum(s + bir_ref[...], 0.0)       # [TB, 2G_pad]
        acc_ref[...] = jnp.zeros_like(acc_ref)

    s_b = s_scr[...].astype(jnp.bfloat16)
    x_rep = jnp.dot(xp_ref[...], rep_ref[...], preferred_element_type=jnp.float32)
    s_rep = jnp.dot(s_b, til_ref[...], preferred_element_type=jnp.float32)
    outer = (x_rep * s_rep).astype(jnp.bfloat16)               # [TB, tile_kd]
    acc_ref[...] += jnp.dot(outer, w1_ref[...],
                            preferred_element_type=jnp.float32)

    @pl.when(k == pl.num_programs(1) - 1)
    def _():
        h = jnp.maximum(acc_ref[...] + b1_ref[...], 0.0).astype(jnp.bfloat16)
        o_ref[...] = (jnp.dot(h, w2_ref[...], preferred_element_type=jnp.float32)
                      + b2_ref[...])


def fusion_decode(x_pairs, ir_score, w_ir, b_ir, w1, b1, w2, b2):
    b, two_g = x_pairs.shape
    add_dim = ir_score.shape[1]
    k_dim = two_g * two_g
    hid = w1.shape[1]
    ncls = w2.shape[1]

    two_g_pad = _round_up(two_g, 128)
    add_pad = _round_up(add_dim, 128)
    hid_p = _round_up(hid, 128)
    cls_p = _round_up(ncls, 128)
    k_pad = _round_up(k_dim, 128)
    tile_kd = _pick_tile(k_pad, (512, 256, 128))
    tb = min(256, _round_up(b, 8))
    b_pad = _round_up(b, tb)

    # lane/sublane-padded operands: bf16 MXU feeds, f32 biases (zero pads keep
    # padded rows/cols exact zeros through the ReLUs).
    xp = (jnp.zeros((b_pad, two_g_pad), jnp.float32)
          .at[:b, :two_g].set(x_pairs).astype(jnp.bfloat16))
    irp = (jnp.zeros((b_pad, add_pad), jnp.float32)
           .at[:b, :add_dim].set(ir_score).astype(jnp.bfloat16))
    wirp = (jnp.zeros((add_pad, two_g_pad), jnp.float32)
            .at[:add_dim, :two_g].set(w_ir).astype(jnp.bfloat16))
    birp = jnp.zeros((1, two_g_pad), jnp.float32).at[0, :two_g].set(b_ir)

    cols = jnp.arange(k_dim)
    rep_sel = (jnp.zeros((two_g_pad, k_pad), jnp.float32)
               .at[cols // two_g, cols].set(1.0).astype(jnp.bfloat16))
    til_sel = (jnp.zeros((two_g_pad, k_pad), jnp.float32)
               .at[cols % two_g, cols].set(1.0).astype(jnp.bfloat16))

    w1p = (jnp.zeros((k_pad, hid_p), jnp.float32)
           .at[:k_dim, :hid].set(w1).astype(jnp.bfloat16))
    b1p = jnp.zeros((1, hid_p), jnp.float32).at[0, :hid].set(b1)
    w2p = (jnp.zeros((hid_p, cls_p), jnp.float32)
           .at[:hid, :ncls].set(w2).astype(jnp.bfloat16))
    b2p = jnp.zeros((1, cls_p), jnp.float32).at[0, :ncls].set(b2)

    out = pl.pallas_call(
        _fusion_decode_kernel,
        out_shape=jax.ShapeDtypeStruct((b_pad, cls_p), jnp.float32),
        grid=(b_pad // tb, k_pad // tile_kd),
        in_specs=[
            pl.BlockSpec((tb, two_g_pad), lambda i, k: (i, 0)),       # x_pairs
            pl.BlockSpec((tb, add_pad), lambda i, k: (i, 0)),         # ir_score
            pl.BlockSpec((add_pad, two_g_pad), lambda i, k: (0, 0)),  # w_ir
            pl.BlockSpec((1, two_g_pad), lambda i, k: (0, 0)),        # b_ir
            pl.BlockSpec((two_g_pad, tile_kd), lambda i, k: (0, k)),  # rep_sel
            pl.BlockSpec((two_g_pad, tile_kd), lambda i, k: (0, k)),  # tile_sel
            pl.BlockSpec((tile_kd, hid_p), lambda i, k: (k, 0)),      # w1 (K-tiled)
            pl.BlockSpec((1, hid_p), lambda i, k: (0, 0)),            # b1
            pl.BlockSpec((hid_p, cls_p), lambda i, k: (0, 0)),        # w2
            pl.BlockSpec((1, cls_p), lambda i, k: (0, 0)),            # b2
        ],
        out_specs=pl.BlockSpec((tb, cls_p), lambda i, k: (i, 0)),
        scratch_shapes=[pltpu.VMEM((tb, two_g_pad), jnp.float32),   # S cache
                        pltpu.VMEM((tb, hid_p), jnp.float32)],      # hidden acc
        compiler_params=pltpu.CompilerParams(
            dimension_semantics=("parallel", "arbitrary"),
            vmem_limit_bytes=32 * 1024 * 1024),
    )(xp, irp, wirp, birp, rep_sel, til_sel, w1p, b1p, w2p, b2p)
    return out[:b, :ncls]


# ----------------------------------------------------------------------------
# Full forward (glue + kernels), mirroring GTNN_outer.forward
# ----------------------------------------------------------------------------
def gtnn_outer_forward(x, edge_index, batch_assign, set_indices, ir_score,
                       params, num_graphs):
    (w_gcn, b_gcn, w_ir, b_ir, w1, b1, w2, b2) = params
    n, dim = x.shape
    gs = w_gcn.shape[1]

    # --- per-graph bookkeeping (mirrors get_minibatch_embeddings) -----------
    counts = jnp.zeros((num_graphs,), jnp.int32).at[batch_assign].add(1)
    index_bases = jnp.concatenate(
        [jnp.zeros((1,), jnp.int32), jnp.cumsum(counts)[:-1]])
    local_idx = jnp.arange(n, dtype=jnp.int32) - index_bases[batch_assign]

    # TODO(synk): max nodes/graph must be static for tiling; computed concretely
    # here (wrapper is not jitted).  Under jit, pass it as a static argument.
    max_nodes = int(jnp.max(counts))

    # tile / padding geometry: lane-granular (128), NOT tile-granular
    npg_pad = _round_up(max_nodes, 128)
    dim_pad = _round_up(dim, 128)
    gs_pad = _round_up(gs, 128)
    tile_k = _pick_tile(npg_pad)

    # --- symmetric GCN normalization without any dense N^2 adjacency --------
    src, dst = edge_index[0], edge_index[1]
    deg = jnp.ones((n,), jnp.float32).at[dst].add(1.0)     # in-degree + self loop
    dinv = jax.lax.rsqrt(deg)

    # --- build ONLY the 2 selected A_norm rows per graph (padded to 8 rows) --
    sel_global = index_bases[:, None] + set_indices        # [B, 2] global ids
    ge = batch_assign[dst]
    src_local = src - index_bases[batch_assign[src]]
    a_sel = jnp.zeros((num_graphs, 8, npg_pad), jnp.float32)
    for p in range(2):
        hit = (dst == sel_global[ge, p]).astype(jnp.float32)
        a_sel = a_sel.at[ge, p, src_local].add(hit)
    a_sel = a_sel.at[jnp.arange(num_graphs)[:, None],
                     jnp.arange(2)[None, :], set_indices].add(1.0)  # self loops
    dinv_blk = (jnp.zeros((num_graphs, npg_pad), jnp.float32)
                .at[batch_assign, local_idx].set(dinv))
    dinv_sel = (jnp.zeros((num_graphs, 8), jnp.float32)
                .at[:, :2].set(dinv[sel_global]))
    a_sel = (a_sel * dinv_sel[:, :, None] * dinv_blk[:, None, :]).astype(jnp.bfloat16)

    # --- node features in per-graph block layout, bf16, lane-padded ---------
    x_pad = jnp.zeros((n, dim_pad), jnp.float32).at[:, :dim].set(x)
    xf = (jnp.zeros((num_graphs, npg_pad, dim_pad), jnp.float32)
          .at[batch_assign, local_idx].set(x_pad).astype(jnp.bfloat16))
    wg = (jnp.zeros((dim_pad, gs_pad), jnp.float32)
          .at[:dim, :gs].set(w_gcn).astype(jnp.bfloat16))
    bg = jnp.zeros((1, gs_pad), jnp.float32).at[0, :gs].set(b_gcn)

    # --- kernel 1: H_sel = relu((A_sel @ X) @ W + b)  (X@W fused, no HBM XW) -
    h_sel = gcn_selected_rows(a_sel, xf, wg, bg, tile_k=tile_k)  # [B, 8, gs_pad]
    x_pairs = h_sel[:, :2, :gs].reshape(num_graphs, 2 * gs)

    # --- kernel 2: fusion + K-tiled decoder ----------------------------------
    logits = fusion_decode(x_pairs, ir_score.astype(jnp.float32),
                           w_ir, b_ir, w1, b1, w2, b2)
    if logits.shape[1] == 1:           # torch .squeeze(dim=1)
        logits = logits[:, 0]
    return logits


# ----------------------------------------------------------------------------
# Pure-JAX reference (dense adjacency, f32) for a sanity check
# ----------------------------------------------------------------------------
def _reference_forward(x, edge_index, batch_assign, set_indices, ir_score,
                       params, num_graphs):
    (w_gcn, b_gcn, w_ir, b_ir, w1, b1, w2, b2) = params
    n = x.shape[0]
    src, dst = edge_index[0], edge_index[1]
    a = jnp.zeros((n, n), jnp.float32).at[dst, src].add(1.0)
    a = a + jnp.eye(n, dtype=jnp.float32)
    deg = jnp.sum(a, axis=1)
    dinv = jnp.where(deg > 0, 1.0 / jnp.sqrt(deg), 0.0)
    a_norm = a * dinv[:, None] * dinv[None, :]
    h = jax.nn.relu(a_norm @ (x @ w_gcn) + b_gcn)
    counts = jnp.zeros((num_graphs,), jnp.int32).at[batch_assign].add(1)
    index_bases = jnp.concatenate(
        [jnp.zeros((1,), jnp.int32), jnp.cumsum(counts)[:-1]])
    xp = h[index_bases[:, None] + set_indices].reshape(num_graphs, -1)
    s = jax.nn.relu(ir_score @ w_ir + b_ir)
    outer = (xp[:, :, None] * s[:, None, :]).reshape(num_graphs, -1)
    hid = jax.nn.relu(outer @ w1 + b1)
    return hid @ w2 + b2


# ----------------------------------------------------------------------------
if __name__ == "__main__":
    key = jax.random.PRNGKey(0)
    N = 32                    # total nodes across the minibatch
    dim = 16                  # input node-feature dim
    gs_dim = 8                # conv output dim
    add_dim = 4               # additional_feature_dim (ir_score)
    nb_classes = 2
    B = 4                     # num_graphs
    npg = N // B              # nodes per graph

    k1, k2, k3, k4, k5, k6 = jax.random.split(key, 6)
    x = jax.random.normal(k1, (N, dim), jnp.float32)
    ir_score = jax.random.normal(k2, (B, add_dim), jnp.float32)

    # batch assignment + a simple bidirectional ring inside each graph
    batch_assign = jnp.repeat(jnp.arange(B, dtype=jnp.int32), npg)
    src_list, dst_list = [], []
    for g in range(B):
        base = g * npg
        for v in range(npg):
            u = base + v
            w = base + (v + 1) % npg
            src_list += [u, w]
            dst_list += [w, u]
    edge_index = jnp.array([src_list, dst_list], dtype=jnp.int32)   # [2, 64]

    # set_indices: the (local) node pair per graph whose link we score
    set_indices = jnp.stack(
        [jnp.arange(B) % npg, (jnp.arange(B) + 3) % npg], axis=1).astype(jnp.int32)

    # deterministic parameter init (shapes from GTNN_outer.__init__, stored [in,out])
    two_g = 2 * gs_dim
    w_gcn = jax.random.normal(k3, (dim, gs_dim), jnp.float32) * 0.1
    b_gcn = jnp.zeros((gs_dim,), jnp.float32)
    w_ir = jax.random.normal(k4, (add_dim, two_g), jnp.float32) * 0.1
    b_ir = jnp.full((two_g,), 0.01, jnp.float32)
    w1 = jax.random.normal(k5, (two_g * two_g, 200), jnp.float32) * 0.05
    b1 = jnp.full((200,), 0.01, jnp.float32)
    w2 = jax.random.normal(k6, (200, nb_classes), jnp.float32) * 0.05
    b2 = jnp.zeros((nb_classes,), jnp.float32)

    params = (w_gcn, b_gcn, w_ir, b_ir, w1, b1, w2, b2)
    logits = gtnn_outer_forward(x, edge_index, batch_assign, set_indices,
                                ir_score, params, num_graphs=B)
    jax.block_until_ready(logits)
    assert logits.shape == (B, nb_classes)

    ref = _reference_forward(x, edge_index, batch_assign, set_indices,
                             ir_score, params, num_graphs=B)
    err = float(jnp.max(jnp.abs(logits - ref)))
    assert err < 5e-2, f"mismatch vs f32 reference: {err}"   # bf16 MXU feeds
    print("KERNEL_OK")
</pallas_src>

<mosaic_0001>
module attributes {stable_mosaic.version = 11 : i64} {
  func.func @_gcn_sel_rows_kernel(%arg0: i32, %arg1: i32, %arg2: memref<1x8x128xbf16, #tpu.memory_space<vmem>>, %arg3: memref<1x128x128xbf16, #tpu.memory_space<vmem>>, %arg4: memref<128x128xbf16, #tpu.memory_space<vmem>>, %arg5: memref<1x128xf32, #tpu.memory_space<vmem>>, %arg6: memref<1x8x128xf32, #tpu.memory_space<vmem>>, %arg7: memref<8x128xf32, #tpu.memory_space<vmem>>) attributes {dimension_semantics = [#tpu.dimension_semantics<parallel>, #tpu.dimension_semantics<arbitrary>], iteration_bounds = array<i64: 4, 1>, scalar_prefetch = 0 : i64, scratch_operands = 1 : i64, tpu.core_type = #tpu.core_type<tc>, window_params = [{transform_indices = @transform_0, window_bounds = array<i64: 1, 8, 128>}, {transform_indices = @transform_1, window_bounds = array<i64: 1, 128, 128>}, {pipeline_mode = #tpu.pipeline_mode<synchronous>, transform_indices = @transform_2, window_bounds = array<i64: 128, 128>}, {pipeline_mode = #tpu.pipeline_mode<synchronous>, transform_indices = @transform_3, window_bounds = array<i64: 1, 128>}, {transform_indices = @transform_4, window_bounds = array<i64: 1, 8, 128>}]} {
    %c0_i32 = arith.constant 0 : i32
    %0 = arith.cmpi eq, %arg1, %c0_i32 : i32
    %1 = arith.extui %0 : i1 to i32
    %c0_i32_0 = arith.constant 0 : i32
    %2 = arith.cmpi ne, %1, %c0_i32_0 : i32
    scf.if %2 {
      %cst_12 = arith.constant 0.000000e+00 : f32
      %14 = vector.broadcast %cst_12 : f32 to vector<8x128xf32>
      %c0_13 = arith.constant 0 : index
      %c0_14 = arith.constant 0 : index
      %15 = vector.load %arg7[%c0_13, %c0_14] : memref<8x128xf32, #tpu.memory_space<vmem>>, vector<8x128xf32>
      tpu.vector_store %arg7[%c0_13, %c0_14], %14 {strides = array<i32>} : memref<8x128xf32, #tpu.memory_space<vmem>>, vector<8x128xf32>,
    } else {
    }
    %c0 = arith.constant 0 : index
    %c0_1 = arith.constant 0 : index
    %3 = vector.load %arg7[%c0, %c0_1] : memref<8x128xf32, #tpu.memory_space<vmem>>, vector<8x128xf32>
    %c0_2 = arith.constant 0 : index
    %c0_3 = arith.constant 0 : index
    %c0_4 = arith.constant 0 : index
    %4 = vector.load %arg2[%c0_2, %c0_3, %c0_4] : memref<1x8x128xbf16, #tpu.memory_space<vmem>>, vector<1x8x128xbf16>
    %5 = vector.shape_cast %4 : vector<1x8x128xbf16> to vector<8x128xbf16>
    %c0_5 = arith.constant 0 : index
    %c0_6 = arith.constant 0 : index
    %c0_7 = arith.constant 0 : index
    %6 = vector.load %arg3[%c0_5, %c0_6, %c0_7] : memref<1x128x128xbf16, #tpu.memory_space<vmem>>, vector<1x128x128xbf16>
    %7 = vector.shape_cast %6 : vector<1x128x128xbf16> to vector<128x128xbf16>
    %cst = arith.constant dense<0.000000e+00> : vector<8x128xf32>
    %8 = tpu.matmul %5, %7, %cst {dimension_numbers = #tpu.dot_dimension_numbers<[1], [0], [0], [1], [0, 0, 1, 1], [], []>} : vector<8x128xbf16>, vector<128x128xbf16>, vector<8x128xf32> -> vector<8x128xf32>
    %9 = arith.addf %3, %8 : vector<8x128xf32>
    %c0_8 = arith.constant 0 : index
    %c0_9 = arith.constant 0 : index
    %10 = vector.load %arg7[%c0_8, %c0_9] : memref<8x128xf32, #tpu.memory_space<vmem>>, vector<8x128xf32>
    tpu.vector_store %arg7[%c0_8, %c0_9], %9 {strides = array<i32>} : memref<8x128xf32, #tpu.memory_space<vmem>>, vector<8x128xf32>,
    %c0_i32_10 = arith.constant 0 : i32
    %11 = arith.cmpi eq, %arg1, %c0_i32_10 : i32
    %12 = arith.extui %11 : i1 to i32
    %c0_i32_11 = arith.constant 0 : i32
    %13 = arith.cmpi ne, %12, %c0_i32_11 : i32
    scf.if %13 {
      %c0_12 = arith.constant 0 : index
      %c0_13 = arith.constant 0 : index
      %14 = vector.load %arg7[%c0_12, %c0_13] : memref<8x128xf32, #tpu.memory_space<vmem>>, vector<8x128xf32>
      %15 = arith.truncf %14 : vector<8x128xf32> to vector<8x128xbf16>
      %c0_14 = arith.constant 0 : index
      %c0_15 = arith.constant 0 : index
      %16 = vector.load %arg4[%c0_14, %c0_15] : memref<128x128xbf16, #tpu.memory_space<vmem>>, vector<128x128xbf16>
      %cst_16 = arith.constant dense<0.000000e+00> : vector<8x128xf32>
      %17 = tpu.matmul %15, %16, %cst_16 {dimension_numbers = #tpu.dot_dimension_numbers<[1], [0], [0], [1], [0, 0, 1, 1], [], []>} : vector<8x128xbf16>, vector<128x128xbf16>, vector<8x128xf32> -> vector<8x128xf32>
      %c0_17 = arith.constant 0 : index
      %c0_18 = arith.constant 0 : index
      %18 = vector.load %arg5[%c0_17, %c0_18] : memref<1x128xf32, #tpu.memory_space<vmem>>, vector<1x128xf32>
      %19 = vector.broadcast %18 : vector<1x128xf32> to vector<8x128xf32>
      %20 = arith.addf %17, %19 : vector<8x128xf32>
      %cst_19 = arith.constant 0.000000e+00 : f32
      %21 = vector.broadcast %cst_19 : f32 to vector<8x128xf32>
      %22 = arith.maximumf %20, %21 : vector<8x128xf32>
      %c0_20 = arith.constant 0 : index
      %c0_21 = arith.constant 0 : index
      %c0_22 = arith.constant 0 : index
      %23 = vector.load %arg6[%c0_20, %c0_21, %c0_22] : memref<1x8x128xf32, #tpu.memory_space<vmem>>, vector<1x8x128xf32>
      %24 = vector.shape_cast %23 : vector<1x8x128xf32> to vector<8x128xf32>
      %25 = vector.shape_cast %22 : vector<8x128xf32> to vector<1x8x128xf32>
      tpu.vector_store %arg6[%c0_20, %c0_21, %c0_22], %25 {strides = array<i32>} : memref<1x8x128xf32, #tpu.memory_space<vmem>>, vector<1x8x128xf32>,
    } else {
    }
    return
  }
  func.func @transform_0(%arg0: i32, %arg1: i32) -> (i32, i32, i32) {
    %c0_i32 = arith.constant 0 : i32
    %c0_i32_0 = arith.constant 0 : i32
    return %arg0, %c0_i32, %arg1 : i32, i32, i32
  }
  func.func @transform_1(%arg0: i32, %arg1: i32) -> (i32, i32, i32) {
    %c0_i32 = arith.constant 0 : i32
    %c0_i32_0 = arith.constant 0 : i32
    return %arg0, %arg1, %c0_i32 : i32, i32, i32
  }
  func.func @transform_2(%arg0: i32, %arg1: i32) -> (i32, i32) {
    %c0_i32 = arith.constant 0 : i32
    %c0_i32_0 = arith.constant 0 : i32
    %c0_i32_1 = arith.constant 0 : i32
    return %c0_i32, %c0_i32_0 : i32, i32
  }
  func.func @transform_3(%arg0: i32, %arg1: i32) -> (i32, i32) {
    %c0_i32 = arith.constant 0 : i32
    %c0_i32_0 = arith.constant 0 : i32
    %c0_i32_1 = arith.constant 0 : i32
    return %c0_i32, %c0_i32_0 : i32, i32
  }
  func.func @transform_4(%arg0: i32, %arg1: i32) -> (i32, i32, i32) {
    %c0_i32 = arith.constant 0 : i32
    %c0_i32_0 = arith.constant 0 : i32
    %c0_i32_1 = arith.constant 0 : i32
    return %arg0, %c0_i32, %c0_i32_0 : i32, i32, i32
  }
}

</mosaic_0001>

<bundles_post_ra>
// kernel: tpu_custom_call.1
= control target key start
LH: loop header
LB: loop body
LE: loop exit
PB: predicated region body
PF: predicated region fallthrough
CT: control target
= control target key end

     0   :  { %s1334_s0 = inlined_call_operand.hbm [shape: bf16[4,8,128], index: 0, kind: input, shape index: {}]   ;;  %s1335_s1 = inlined_call_operand.hbm [shape: bf16[4,128,128], index: 1, kind: input, shape index: {}]   ;;  %s1336_s2 = inlined_call_operand.hbm [shape: bf16[128,128], index: 2, kind: input, shape index: {}]   ;;  %s1337_s3 = inlined_call_operand.vmem [shape: f32[1,128], index: 3, kind: input, shape index: {}]   ;;  %s1338_s4 = inlined_call_operand.hbm [shape: f32[4,8,128], index: 4, kind: output, shape index: {}]  }
   0x1   :  { %1344 = sst [smem:[#allocation14_spill]] %s1334_s0 }
   0x2   :  { %1345 = sst [smem:[#allocation15_spill]] %s1336_s2 }
   0x3   :  { %9 = vsyncpa [#allocation4], 0 }
   0x4   :  { %11 = vsyncpa [#allocation4 + $0x1], 0 }
   0x5   :  { %12 = vsyncpa [#allocation7], 0 }
   0x6   :  { %14 = vsyncpa [#allocation7 + $0x1], 0 }
   0x7   :  { %15 = vsyncpa [#allocation5], 0 }
   0x8   :  { %17 = vsyncpa [#allocation5 + $0x1], 0  ;;  %s1053_s15 = smov 0   ;;  %s1055_s16 = smov 0  }
   0x9   :  { %s1057_s17 = smov 0   ;;  %s1059_s18 = smov 0  }
   0xa   :  { %s1061_s19 = smov 0   ;;  %s1063_s20 = smov 0  }
   0xb LB: > { %s1084_s21 = sadd.s32 4294967295, %s1018_s20   ;;  %s648_s22 = sadd.s32 4294967294, %s1018_s20   ;;  %s1018_s20 = sphi %s1063_s20, %s23_s20   ;;  %s1014_s19 = sphi %s1061_s19, %s1368_s19   ;;  %s1010_s18 = sphi %s1059_s18, %s1367_s18   ;;  %s1006_s17 = sphi %s1057_s17, %s1366_s17   ;;  %s1002_s16 = sphi %s1055_s16, %s1365_s16   ;;  %s998_s15 = sphi %s1053_s15, %s1364_s15  }
   0xc   : > { %p57_p0 = scmp.ne.s32.totalorder %s1002_s16, %s998_s15  ;;  %p1339_p1 = scmp.eq.s32.totalorder %s1084_s21, 0 }
   0xd   : > { %p157_p3 = scmp.eq.s32.totalorder %s648_s22, 3  ;;  %p649_p5 = scmp.ge.s32.totalorder %s1018_s20, 1 }
   0xe   : > { %p1093_p4 = por %p1339_p1, %p57_p0  ;;  %p164_p7 = scmp.lt.s32.totalorder %s1018_s20, 5 }
   0xf   : > { %p1098_p6 = por %p157_p3, %p57_p0  ;;  %s1020_s26 = smov [#allocation8]  }
  0x10   : > { %s1346_s23 = scalar_select %p1093_p4, 1, 0 }
  0x11   : > { %s1347_s24 = scalar_select %p1098_p6, 1, 0 }
  0x12   : > { %p1103_p8 = pnand %p649_p5, %p164_p7  ;;  %s176_s27 = sshll.u32 %s1020_s26, 4  ;;  %s177_s27 = int_to_ptr.vmem [resolvable:$true] %s176_s27 }
  0x13   : > { %s35_s29 = sadd.s32 1, %s1014_s19  ;;  %s1350_s2 = sld [smem:[#allocation15_spill]] }
  0x14   : > { %s1348_s25 = scalar_select %p1103_p8, 1, 0 }
  0x15   : > { %p752_p9 = pneg %p1103_p8 }
  0x17   : > { %p1111_p10 = pnand %p752_p9, %p1339_p1 }
  0x19   : > { %s840_s6 = scalar_lea.hbm %s1350_s2, 1024  ;;  %p842_p12 = pneg %p1111_p10 }
  0x1a   : > { %p841_p11 = scmp.ne.s32.totalorder %s1350_s2, %s840_s6  ;;  %p847_p3 = scmp.lt.u32.totalorder %s840_s6, %s1350_s2 }
  0x1c   : > { %p843_p13 = pnand %p842_p12, %p841_p11 }
  0x1e   : > { %p844_p0 = pneg %p843_p13 }
  0x20   : > { %p849_p5 = pnand %p847_p3, %p844_p0 }
  0x22   : > { %852 = shalt.err (!%p849_p5)
}
  0x23   : > { %s853_s11 = scalar_lea.vmem %s177_s27, 1024  ;;  %p861_p2 = scmp.lt.s32.totalorder %s177_s27, %s177_s27 }
  0x24   : > { %p854_p7 = scmp.ne.s32.totalorder %s177_s27, %s853_s11  ;;  %p862_p6 = scmp.lt.s32.totalorder %s853_s11, %s853_s11 }
  0x26   : > { %p856_p9 = pnand %p854_p7, %p842_p12  ;;  %p863_p4 = por %p862_p6, %p861_p2 }
  0x28   : > { %p857_p1 = pneg %p856_p9 }
  0x2a   : > { %p864_p8 = pnand %p863_p4, %p857_p1 }
  0x2c   : > { %867 = shalt.err (!%p864_p8)
}
  0x2d   : > { %s1342_s12 = smov 64   ;;  %s1343_s13 = smov 4  }
  0x2e   : > { %755 = dma.hbm_to_vmem [thread:$0]  (!%p1111_p10), %s1350_s2, 1024, %s177_s27, [#allocation7], %s1342_s12, %s1342_s12, %s1343_s13  }
  0x2f   : > { %p37_p1 = scmp.ge.s32.totalorder %s35_s29, 4  ;;  %s44_s26 = sadd.s32 1, %s1006_s17 }
  0x30   : > { %p51_p2 = scmp.ne.s32.totalorder %s1006_s17, %s1002_s16  ;;  %p52_p4 = scmp.eq.s32.totalorder %s1018_s20, 0 }
  0x31   : > { %s1370_s29 = smov (%p37_p1, %s35_s29), 0  ;;  %p1352_p8 = scmp.eq.s32.totalorder %s1084_s21, 3 }
  0x32   : > { %p1141_p6 = por %p52_p4, %p51_p2  ;;  %s39_s5 = ssub.s32 %s1014_s19, %s1370_s29 }
  0x33   : > { %p1147_p11 = por %p1352_p8, %p51_p2  ;;  %p768_p10 = scmp.lt.s32.totalorder %s1018_s20, 4 }
  0x34   : > { %p42_p12 = scmp.eq.s32.totalorder %s39_s5, 0  ;;  %s1155_s27 = sand.u32 1, %s1006_s17  }
  0x35   : > { %s652_s6 = sshll.u32 %s1155_s27, 2  ;;  %s653_s8 = sshll.u32 %s1014_s19, 6 }
  0x36   : > { %s1159_s7 = scalar_select %p42_p12, %s1006_s17, %s44_s26  }
  0x37   : > { %s1354_s0 = sld [smem:[#allocation14_spill]]  ;;  %s197_s14 = scalar_lea.vmem [#allocation3], %s652_s6 }
  0x38   : > { %s205_s22 = sshll.u32 %s197_s14, 4  ;;  %p1171_p13 = pnand %p768_p10, %p1141_p6  ;;  %s1167_s22 = int_to_ptr.vmem [resolvable:$true] %s205_s22 }
  0x39   : > { %s654_s26 = sshll.u32 %s1155_s27, 6  ;;  %s194_s9 = scalar_lea.sflag [#allocation4], %s1155_s27 }
  0x3a   : > { %p870_p3 = pneg %p1171_p13 }
  0x3d   : > { %s1165_s11 = scalar_lea.hbm %s1354_s0, %s653_s8  ;;  %s873_s30 = scalar_lea.hbm %s1354_s0, 256 }
  0x3e   : > { %s868_s8 = scalar_lea.hbm %s1165_s11, 64  ;;  %p874_p9 = scmp.lt.u32.totalorder %s1165_s11, %s1354_s0 }
  0x3f   : > { %p869_p0 = scmp.ne.s32.totalorder %s1165_s11, %s868_s8  ;;  %p875_p1 = scmp.lt.u32.totalorder %s873_s30, %s868_s8 }
  0x40   : > { %p877_p4 = scmp.lt.u32.totalorder %s868_s8, %s1165_s11 }
  0x41   : > { %p871_p5 = pnand %p870_p3, %p869_p0  ;;  %p876_p2 = por %p875_p1, %p874_p9 }
  0x43   : > { %p872_p7 = pneg %p871_p5  ;;  %p878_p6 = por %p877_p4, %p876_p2 }
  0x45   : > { %p879_p8 = pnand %p878_p6, %p872_p7 }
  0x47   : > { %882 = shalt.err (!%p879_p8)
}
  0x48   : > { %s883_s12 = scalar_lea.vmem %s1167_s22, 64  ;;  %s1023_s6 = smov [#allocation3]  }
  0x49   : > { %p884_p10 = scmp.ne.s32.totalorder %s1167_s22, %s883_s12  ;;  %s888_s10 = sshll.u32 %s1023_s6, 4  ;;  %s889_s10 = int_to_ptr.vmem [resolvable:$false] %s888_s10 }
  0x4a   : > { %s890_s13 = scalar_lea.vmem %s889_s10, 128  ;;  %p891_p5 = scmp.lt.s32.totalorder %s1167_s22, %s889_s10 }
  0x4b   : > { %p886_p12 = pnand %p884_p10, %p870_p3  ;;  %p892_p9 = scmp.lt.s32.totalorder %s890_s13, %s883_s12 }
  0x4d   : > { %p887_p0 = pneg %p886_p12  ;;  %p893_p1 = por %p892_p9, %p891_p5 }
  0x4f   : > { %p894_p2 = pnand %p893_p1, %p887_p0 }
  0x51   : > { %897 = shalt.err (!%p894_p2)
}
  0x52   : > { %759 = dma.hbm_to_vmem [thread:$0]  (!%p1171_p13), %s1165_s11, 64, %s1167_s22, %s194_s9  }
  0x53   : > { %s216_s8 = scalar_lea.vmem [#allocation6], %s654_s26  ;;  %s212_s14 = sand.u32 1, %s1018_s20  }
  0x54   : > { %s225_s30 = sshll.u32 %s216_s8, 4  ;;  %s1356_s6 = sshll.u32 %s1014_s19, 10  ;;  %s1206_s30 = int_to_ptr.vmem [resolvable:$true] %s225_s30 }
  0x55   : > { %s1213_s13 = scalar_lea.hbm %s1335_s1, %s1356_s6  ;;  %s1215_s0 = scalar_lea.sflag [#allocation7], %s212_s14 }
  0x56   : > { %s898_s2 = scalar_lea.hbm %s1213_s13, 1024  ;;  %s903_s22 = scalar_lea.hbm %s1335_s1, 4096 }
  0x57   : > { %p899_p7 = scmp.ne.s32.totalorder %s1213_s13, %s898_s2  ;;  %p904_p8 = scmp.lt.u32.totalorder %s1213_s13, %s1335_s1 }
  0x58   : > { %p905_p10 = scmp.lt.u32.totalorder %s903_s22, %s898_s2  ;;  %p907_p0 = scmp.lt.u32.totalorder %s898_s2, %s1213_s13 }
  0x59   : > { %p901_p4 = pnand %p899_p7, %p870_p3 }
  0x5a   : > { %p906_p12 = por %p905_p10, %p904_p8 }
  0x5b   : > { %p902_p6 = pneg %p901_p4 }
  0x5c   : > { %p908_p5 = por %p907_p0, %p906_p12 }
  0x5e   : > { %p909_p9 = pnand %p908_p5, %p902_p6 }
  0x60   : > { %912 = shalt.err (!%p909_p9)
}
  0x61   : > { %s913_s8 = scalar_lea.vmem %s1206_s30, 1024  ;;  %s1024_s14 = smov [#allocation6]  }
  0x62   : > { %p914_p1 = scmp.ne.s32.totalorder %s1206_s30, %s913_s8  ;;  %s918_s6 = sshll.u32 %s1024_s14, 4  ;;  %s919_s6 = int_to_ptr.vmem [resolvable:$false] %s918_s6 }
  0x63   : > { %s920_s12 = scalar_lea.vmem %s919_s6, 2048  ;;  %p921_p4 = scmp.lt.s32.totalorder %s1206_s30, %s919_s6 }
  0x64   : > { %p916_p2 = pnand %p914_p1, %p870_p3  ;;  %p922_p8 = scmp.lt.s32.totalorder %s920_s12, %s913_s8 }
  0x66   : > { %p917_p7 = pneg %p916_p2  ;;  %p923_p10 = por %p922_p8, %p921_p4 }
  0x68   : > { %p924_p12 = pnand %p923_p10, %p917_p7 }
  0x6a   : > { %927 = shalt.err (!%p924_p12)
}
  0x6b   : > { %s1357_s2 = smov 4   ;;  %s1358_s10 = smov 64  }
  0x6c   : > { %762 = dma.hbm_to_vmem [thread:$0]  (!%p1171_p13), %s1213_s13, 1024, %s1206_s30, %s1215_s0, %s1358_s10, %s1358_s10, %s1357_s2  }
  0x6d   : > { %p1359_p3 = scmp.ne.s32.totalorder %s1348_s25, 0 }
  0x6e   : > { %s1247_s27 = sand.u32 (!%p1359_p3), 1, %s1002_s16   ;;  %p1360_p6 = scmp.ne.s32.totalorder (!%p1359_p3), %s1346_s23, 0 }
  0x6f   : > { %237 = sbr.rel (%p1359_p3) target bundleno = 603 (0x25b), region = 36  ;;  %s658_s11 = sshll.u32 (!%p1359_p3), %s1247_s27, 2 }
  0x70   : > { %s240_s22 = scalar_lea.sflag (!%p1359_p3), [#allocation4], %s1247_s27  ;;  %s1251_s26 = scalar_lea.vmem (!%p1359_p3), [#allocation3], %s658_s11 }
  0x76   : > { %981 = dma.done.wait (%p1360_p6), %s240_s22, 64  }
  0x77   : > { %983 = vsyncadd (%p1360_p6), %s240_s22, 4294967232  ;;  %s248_s0 = sand.u32 1, %s1084_s21   ;;  %s659_s25 = sshll.u32 %s1247_s27, 6 }
  0x78   : > { %s249_s5 = scalar_lea.sflag [#allocation7], %s248_s0  ;;  %s1259_s30 = scalar_lea.vmem [#allocation6], %s659_s25 }
  0x79   : > { %985 = dma.done.wait (%p1360_p6), %s249_s5, 1024  }
  0x7a   : > { %987 = vsyncadd (%p1360_p6), %s249_s5, 4294966272  ;;  %p1361_p13 = scmp.eq.s32.totalorder %s1084_s21, 0 }
  0x7c   : > { %989 = dma.done.wait (%p1361_p13), [#allocation7], 1024   ;;  %p1362_p0 = pmov %p1361_p13 }
  0x7d   : > { %v1025_v0 = vmov 0.0   ;;  %vm1026_vm0 = vmmov 0   ;;  %v824_v1 = vld [vmem:[%s1259_s30] sm:$0xff]   ;;  %v825_v2 = vld [vmem:[%s1259_s30 + $0x8] sm:$0xff]   ;;  %v826_v3 = vld [vmem:[%s1259_s30 + $0x10] sm:$0xff]   ;;  %s661_s21 = sshll.u32 %s1247_s27, 3 }
  0x7e   : > { %991 = vsyncadd (%p1362_p0), [#allocation7], 4294966272  ;;  %702 = vmatprep.subr.bf16.mxu0 %v1025_v0  ;;  %718 = vmatprep.mubr.msk.bf16.mxu0 %vm1026_vm0, %v1025_v0  ;;  %v832_v4 = vld [vmem:[#allocation8] sm:$0xff]   ;;  %v827_v5 = vld [vmem:[%s1259_s30 + $0x18] sm:$0xff]   ;;  %s680_s9 = sshll.u32 %s1010_s18, 7  ;;  %s285_s8 = scalar_lea.vmem [#allocation9], %s661_s21 }
  0x7f   : > { %722 = vmatprep.subr.bf16.mxu1 %v1025_v0  ;;  %738 = vmatprep.mubr.msk.bf16.mxu1 %vm1026_vm0, %v1025_v0  ;;  %v833_v6 = vld [vmem:[#allocation8 + $0x8] sm:$0xff]   ;;  %v828_v7 = vld [vmem:[%s1259_s30 + $0x20] sm:$0xff]   ;;  %v834_v8 = vld [vmem:[#allocation8 + $0x10] sm:$0xff]   ;;  %s533_s14 = sshll.u32 %s285_s8, 4  ;;  %s1286_s2 = scalar_lea.hbm %s1338_s4, %s680_s9  ;;  %s1288_s14 = int_to_ptr.vmem [resolvable:$true] %s533_s14 }
  0x80   : > { %703 = vmatpush3.bf16.msra.mxu0 %v824_v1  ;;  %723 = vmatpush3.bf16.msra.mxu1 %v832_v4  ;;  %v829_v9 = vld [vmem:[%s1259_s30 + $0x28] sm:$0xff]   ;;  %v835_v10 = vld [vmem:[#allocation8 + $0x18] sm:$0xff]   ;;  %v830_v11 = vld [vmem:[%s1259_s30 + $0x30] sm:$0xff]   ;;  %s520_s10 = scalar_lea.sflag [#allocation5], %s1247_s27  ;;  %s928_s18 = scalar_lea.vmem %s1288_s14, 128 }
  0x81   : > { %704 = vmatprep.subr.bf16.mxu0 %v1025_v0  ;;  %724 = vmatprep.subr.bf16.mxu1 %v1025_v0  ;;  %v836_v12 = vld [vmem:[#allocation8 + $0x20] sm:$0xff]   ;;  %v831_v13 = vld [vmem:[%s1259_s30 + $0x38] sm:$0xff]   ;;  %v837_v14 = vld [vmem:[#allocation8 + $0x28] sm:$0xff]   ;;  %p929_p5 = scmp.ne.s32.totalorder %s1288_s14, %s928_s18  ;;  %s1027_s11 = smov [#allocation9]  }
  0x82   : > { %v294_v15 = vld [vmem:[%s1251_s26] sm:$0xf]  ;;  %v838_v16 = vld [vmem:[#allocation8 + $0x30] sm:$0xff]   ;;  %s932_s22 = sshll.u32 %s1027_s11, 4  ;;  %s933_s22 = int_to_ptr.vmem [resolvable:$false] %s932_s22 }
  0x83   : > { %v839_v17 = vld [vmem:[#allocation8 + $0x38] sm:$0xff]   ;;  %p930_p9 = pnand %p929_p5, %p1147_p11  ;;  %s934_s26 = scalar_lea.vmem %s933_s22, 256 }
  0x84   : > { %705 = vmatpush3.bf16.msra.mxu0 %v825_v2  ;;  %725 = vmatpush3.bf16.msra.mxu1 %v833_v6  ;;  %v670_v23 = vld [vmem:[%s1337_s3] ss:$0 sm:$0xff]  ;;  %p935_p2 = scmp.lt.s32.totalorder %s1288_s14, %s933_s22  ;;  %p936_p7 = scmp.lt.s32.totalorder %s934_s26, %s928_s18 }
  0x85   : > { %706 = vmatprep.subr.bf16.mxu0 %v1025_v0  ;;  %726 = vmatprep.subr.bf16.mxu1 %v1025_v0  ;;  %p931_p1 = pneg %p930_p9 }
  0x86   : > { %p937_p4 = por %p936_p7, %p935_p2 }
  0x88   : > { %707 = vmatpush3.bf16.msra.mxu0 %v826_v3  ;;  %727 = vmatpush3.bf16.msra.mxu1 %v834_v8  ;;  %p938_p8 = pnand %p937_p4, %p931_p1 }
  0x89   : > { %708 = vmatprep.subr.bf16.mxu0 %v1025_v0  ;;  %728 = vmatprep.subr.bf16.mxu1 %v1025_v0 }
  0x8c   : > { %709 = vmatpush3.bf16.msra.mxu0 %v827_v5  ;;  %729 = vmatpush3.bf16.msra.mxu1 %v835_v10 }
  0x8d   : > { %710 = vmatprep.subr.bf16.mxu0 %v1025_v0  ;;  %730 = vmatprep.subr.bf16.mxu1 %v1025_v0 }
  0x90   : > { %711 = vmatpush3.bf16.msra.mxu0 %v828_v7  ;;  %731 = vmatpush3.bf16.msra.mxu1 %v836_v12 }
  0x91   : > { %712 = vmatprep.subr.bf16.mxu0 %v1025_v0  ;;  %732 = vmatprep.subr.bf16.mxu1 %v1025_v0 }
  0x94   : > { %713 = vmatpush3.bf16.msra.mxu0 %v829_v9  ;;  %733 = vmatpush3.bf16.msra.mxu1 %v837_v14 }
  0x95   : > { %714 = vmatprep.subr.bf16.mxu0 %v1025_v0  ;;  %734 = vmatprep.subr.bf16.mxu1 %v1025_v0 }
  0x98   : > { %715 = vmatpush3.bf16.msra.mxu0 %v830_v11  ;;  %735 = vmatpush3.bf16.msra.mxu1 %v838_v16 }
  0x99   : > { %716 = vmatprep.subr.bf16.mxu0 %v1025_v0  ;;  %736 = vmatprep.subr.bf16.mxu1 %v1025_v0 }
  0x9c   : > { %717 = vmatpush3.bf16.msra.mxu0 %v831_v13  ;;  %737 = vmatpush3.bf16.msra.mxu1 %v839_v17 }
  0x9f   : > { %719 = vmatmul.mubr.bf16.vlgmr.msra.gmra.mrb[0].mxu0 %v294_v15 }
 0x172   : > { %v393_v18 = vpop.f32.mrb[0].mxu0 }
 0x173   : > { %v405_v19 = vpack.c.bf16 %v393_v18, %v393_v18  ;;  %v720_v20 = vpop.f32.mrb[1].mxu0 }
 0x174   : > { %v396_v21 = vpop.f32.mrb[2].mxu0 }
 0x175   : > { %v721_v22 = vpop.f32.mrb[3].mxu0  ;;  %739 = vmatmul.mubr.bf16.vlgmr.msra.gmra.mrb[0].mxu1 %v405_v19 }
 0x248   : > { %v511_v24 = vpop.f32.mrb[0].mxu1 }
 0x249   : > { %v512_v25 = vadd.f32 %v670_v23, %v511_v24  ;;  %v740_v26 = vpop.f32.mrb[1].mxu1 }
 0x24a   : > { %v514_v27 = vpop.f32.mrb[2].mxu1 }
 0x24b   : > { %v517_v28 = vmax.f32 %v512_v25, 0.0  ;;  %v741_v29 = vpop.f32.mrb[3].mxu1 }
 0x24d   : > { %518 = vst [vmem:[%s285_s8] sm:$0xff] %v517_v28 }
 0x24e   : > { %941 = shalt.err (!%p938_p8)
}
 0x24f   : > { %s942_s27 = scalar_lea.hbm %s1286_s2, 128  ;;  %s946_s5 = scalar_lea.hbm %s1338_s4, 512 }
 0x250   : > { %p943_p10 = scmp.ne.s32.totalorder %s1286_s2, %s942_s27  ;;  %p947_p6 = scmp.lt.u32.totalorder %s1286_s2, %s1338_s4 }
 0x251   : > { %p948_p13 = scmp.lt.u32.totalorder %s946_s5, %s942_s27  ;;  %p950_p5 = scmp.lt.u32.totalorder %s942_s27, %s1286_s2 }
 0x252   : > { %p944_p12 = pnand %p943_p10, %p1147_p11 }
 0x253   : > { %p949_p0 = por %p948_p13, %p947_p6 }
 0x254   : > { %p945_p3 = pneg %p944_p12 }
 0x255   : > { %p951_p9 = por %p950_p5, %p949_p0 }
 0x257   : > { %p952_p1 = pnand %p951_p9, %p945_p3 }
 0x259   : > { %955 = shalt.err (!%p952_p1)
}
 0x25a   : > { %750 = dma.vmem_to_hbm [thread:$0]  (%p1147_p11), %s1288_s14, 128, %s1286_s2, %s520_s10  }
 0x25b PF: > { %p770_p2 = scmp.ge.s32.totalorder %s1018_s20, 2  ;;  %s545_s23 = sand.u32 1, %s998_s15  }
 0x25c   : > { %p1363_p7 = scmp.ne.s32.totalorder %s1347_s24, 0  ;;  %s546_s13 = scalar_lea.sflag [#allocation5], %s545_s23 }
 0x25e   : > { %p764_p4 = pnand %p770_p2, %p1363_p7 }
 0x260   : > { %993 = dma.done.wait (!%p764_p4), %s546_s13, 128  }
 0x261   : > { %995 = vsyncadd (!%p764_p4), %s546_s13, 4294967168  ;;  %s23_s20 = sadd.s32 1, %s1018_s20   ;;  %s1364_s15 = smov %s1002_s16 }
 0x262   : > { %p20_p8 = scmp.ge.s32.totalorder %s23_s20, 6   ;;  %s1365_s16 = smov %s1006_s17 }
 0x263   : > { %s1366_s17 = smov %s1159_s7  ;;  %s1367_s18 = smov %s1014_s19 }
 0x264   : > { %s1368_s19 = smov %s1370_s29  ;;  %22 = sbr.rel (!%p20_p8) target bundleno = 11 (0xb), region = 106 }
 0x26b   :  { %551 = vsyncpa [#allocation4], 1 }
 0x26c   :  { %553 = vsyncpa [#allocation4 + $0x1], 1 }
 0x26d   :  { %554 = vsyncpa [#allocation7], 1 }
 0x26e   :  { %556 = vsyncpa [#allocation7 + $0x1], 1 }
 0x26f   :  { %557 = vsyncpa [#allocation5], 1 }
 0x270   :  { %559 = vsyncpa [#allocation5 + $0x1], 1 }

</bundles_post_ra>
